<compile_context>
chip_gen: v7x
topology: tpu7x:2x2x1
jax: 0.10.0
libtpu: 0.0.40
codegen_flags: <defaults>
</compile_context>

<pallas_src>
import functools
from typing import Optional

import jax
import jax.numpy as jnp
from jax.experimental import pallas as pl
from jax.experimental.pallas import tpu as pltpu


def _round_up(v: int, m: int) -> int:
    return (v + m - 1) // m * m


def _pick_hidden_tile(H: int) -> int:
    # Keep (D, 2*tH) + (tH, D) bf16 tiles (double-buffered) comfortably under the
    # 48 MiB scoped-VMEM budget even for llama-sized D; tH <= 512, multiple of 128.
    for cand in (512, 256, 128):
        if H % cand == 0:
            return cand
    return H  # small / odd hidden dims: take the whole extent (full-extent block)


def _ffn_kernel(x_ref, w13_ref, w2_ref, o_ref, acc_ref, *, th):
    """One (token-tile, hidden-tile) grid step.

    x_ref   : (tm, D)     bf16 activations
    w13_ref : (D, 2*th)   fused [w1 tile | w3 tile], bf16
    w2_ref  : (th, D)     bf16
    o_ref   : (tm, D)     output tile (written only at the last hidden step)
    acc_ref : (tm, D) f32 VMEM accumulator, resident across the hidden axis
    """
    h = pl.program_id(1)

    @pl.when(h == 0)
    def _init():
        acc_ref[...] = jnp.zeros_like(acc_ref)

    # Fused first GEMM: one MXU matmul covers both w1 and w3 (shared LHS).
    hh = jnp.dot(x_ref[...], w13_ref[...], preferred_element_type=jnp.float32)
    g = hh[:, :th] * hh[:, th:]           # w1(x) * w3(x)   (this hidden tile), f32
    act = g * jax.nn.sigmoid(g)           # silu AFTER the product (module spec), f32

    # Second GEMM: partial contraction over this hidden tile, accumulate in f32.
    acc_ref[...] += jnp.dot(act.astype(w2_ref.dtype), w2_ref[...],
                            preferred_element_type=jnp.float32)

    @pl.when(h == pl.num_programs(1) - 1)
    def _finalize():
        o_ref[...] = acc_ref[...].astype(o_ref.dtype)


@functools.partial(jax.jit, static_argnames=("tm", "th", "mxu_dtype"))
def _ffn_impl(x2d, w1, w3, w2, *, tm, th, mxu_dtype):
    M, D = x2d.shape
    H = w1.shape[1]
    n_h = H // th
    n_m = M // tm

    # Fuse w1/w3 per hidden tile: block h of w13 = [w1[:, h*th:(h+1)*th] | w3[:, ...]].
    w13 = jnp.concatenate(
        [w1.reshape(D, n_h, th), w3.reshape(D, n_h, th)], axis=2
    ).reshape(D, 2 * H).astype(mxu_dtype)
    xq = x2d.astype(mxu_dtype)
    w2q = w2.astype(mxu_dtype)

    itm = jnp.dtype(mxu_dtype).itemsize
    flops = 2 * M * D * (2 * H) + 2 * M * H * D
    bytes_accessed = ((M * D + D * 2 * H + H * D) * itm
                      + M * D * jnp.dtype(x2d.dtype).itemsize)
    cost = pl.CostEstimate(flops=flops, transcendentals=M * H,
                           bytes_accessed=bytes_accessed)

    return pl.pallas_call(
        functools.partial(_ffn_kernel, th=th),
        out_shape=jax.ShapeDtypeStruct((M, D), x2d.dtype),
        grid=(n_m, n_h),
        in_specs=[
            pl.BlockSpec((tm, D), lambda i, h: (i, 0)),        # activation tile
            pl.BlockSpec((D, 2 * th), lambda i, h: (0, h)),    # fused [w1|w3] tile
            pl.BlockSpec((th, D), lambda i, h: (h, 0)),        # w2 tile
        ],
        out_specs=pl.BlockSpec((tm, D), lambda i, h: (i, 0)),
        scratch_shapes=[pltpu.VMEM((tm, D), jnp.float32)],
        compiler_params=pltpu.CompilerParams(
            dimension_semantics=("parallel", "arbitrary"),
            vmem_limit_bytes=48 * 1024 * 1024,
        ),
        cost_estimate=cost,
    )(xq, w13, w2q)


def feedforward_pallas(x, w1, w3, w2, *, tm=None, th=None, mxu_dtype=jnp.bfloat16):
    """SwiGLU-variant FFN:  w2( silu( w1(x) * w3(x) ) ).

    x : (..., D).  w1, w3 : (D, H).  w2 : (H, D).  Weights are stored
    (in_features, out_features), i.e. the transpose of the PyTorch weight.
    """
    *lead, D = x.shape
    H = w1.shape[1]
    x2d = x.reshape(-1, D)
    M = x2d.shape[0]

    if tm is None:
        tm = 256 if M >= 256 else _round_up(M, 8)
    if th is None:
        th = _pick_hidden_tile(H)

    M_pad = _round_up(M, tm)
    if M_pad != M:
        x2d = jnp.pad(x2d, ((0, M_pad - M), (0, 0)))

    out = _ffn_impl(x2d, w1, w3, w2, tm=tm, th=th, mxu_dtype=mxu_dtype)
    if M_pad != M:
        out = out[:M]
    return out.reshape(*lead, D)


def compute_hidden_dim(dim: int, hidden_dim: int, multiple_of: int,
                       ffn_dim_multiple: Optional[float]) -> int:
    h = int(ffn_dim_multiple * dim) if ffn_dim_multiple is not None else hidden_dim
    return multiple_of * ((h + multiple_of - 1) // multiple_of)


if __name__ == "__main__":
    # Module hyperparameters (small, TPU-tile friendly).
    dim = 128
    hidden_dim_arg = 256
    multiple_of = 128
    ffn_dim_multiple = None
    hidden_dim = compute_hidden_dim(dim, hidden_dim_arg, multiple_of, ffn_dim_multiple)

    batch, seq = 2, 8
    key = jax.random.PRNGKey(0)
    kx, k1, k2, k3 = jax.random.split(key, 4)

    x = jax.random.normal(kx, (batch, seq, dim), dtype=jnp.float32)
    # Deterministic parameter init (stored as (in, out) == PyTorch weight.T).
    w1 = jax.random.normal(k1, (dim, hidden_dim), dtype=jnp.float32) * 0.02
    w3 = jax.random.normal(k3, (dim, hidden_dim), dtype=jnp.float32) * 0.02
    w2 = jax.random.normal(k2, (hidden_dim, dim), dtype=jnp.float32) * 0.02

    out = feedforward_pallas(x, w1, w3, w2)
    jax.block_until_ready(out)
    out_flat = out.reshape(-1, dim)
    x_flat = x.reshape(-1, dim)

    # Reference matching the kernel's mixed precision (bf16 MXU operands, f32 accum).
    xb = x_flat.astype(jnp.bfloat16)
    w1b, w3b, w2b = (w.astype(jnp.bfloat16) for w in (w1, w3, w2))
    g = (jnp.dot(xb, w1b, preferred_element_type=jnp.float32)
         * jnp.dot(xb, w3b, preferred_element_type=jnp.float32))
    act = (g * jax.nn.sigmoid(g)).astype(jnp.bfloat16)
    ref_mixed = jnp.dot(act, w2b, preferred_element_type=jnp.float32)

    # Pure f32 reference (loose tolerance: bf16 MXU cast error only).
    g32 = (x_flat @ w1) * (x_flat @ w3)
    ref_f32 = (g32 * jax.nn.sigmoid(g32)) @ w2

    assert jnp.allclose(out_flat, ref_mixed, atol=2e-4, rtol=2e-3), "mixed-precision mismatch"
    assert jnp.allclose(out_flat, ref_f32, atol=5e-3, rtol=5e-2), "f32 reference mismatch"

    print("KERNEL_OK")
</pallas_src>

<mosaic_0001>
module attributes {stable_mosaic.version = 11 : i64} {
  func.func @_ffn_kernel(%arg0: i32, %arg1: i32, %arg2: memref<16x128xbf16, #tpu.memory_space<vmem>>, %arg3: memref<128x512xbf16, #tpu.memory_space<vmem>>, %arg4: memref<256x128xbf16, #tpu.memory_space<vmem>>, %arg5: memref<16x128xf32, #tpu.memory_space<vmem>>, %arg6: memref<16x128xf32, #tpu.memory_space<vmem>>) attributes {dimension_semantics = [#tpu.dimension_semantics<parallel>, #tpu.dimension_semantics<arbitrary>], iteration_bounds = array<i64: 1, 1>, scalar_prefetch = 0 : i64, scratch_operands = 1 : i64, tpu.core_type = #tpu.core_type<tc>, window_params = [{transform_indices = @transform_0, window_bounds = array<i64: 16, 128>}, {transform_indices = @transform_1, window_bounds = array<i64: 128, 512>}, {transform_indices = @transform_2, window_bounds = array<i64: 256, 128>}, {transform_indices = @transform_3, window_bounds = array<i64: 16, 128>}]} {
    %c0_i32 = arith.constant 0 : i32
    %0 = arith.cmpi eq, %arg1, %c0_i32 : i32
    %1 = arith.extui %0 : i1 to i32
    %c0_i32_0 = arith.constant 0 : i32
    %2 = arith.cmpi ne, %1, %c0_i32_0 : i32
    scf.if %2 {
      %cst_14 = arith.constant 0.000000e+00 : f32
      %24 = vector.broadcast %cst_14 : f32 to vector<16x128xf32>
      %c0_15 = arith.constant 0 : index
      %c0_16 = arith.constant 0 : index
      %25 = vector.load %arg6[%c0_15, %c0_16] : memref<16x128xf32, #tpu.memory_space<vmem>>, vector<16x128xf32>
      tpu.vector_store %arg6[%c0_15, %c0_16], %24 {strides = array<i32>} : memref<16x128xf32, #tpu.memory_space<vmem>>, vector<16x128xf32>,
    } else {
    }
    %c0 = arith.constant 0 : index
    %c0_1 = arith.constant 0 : index
    %3 = vector.load %arg2[%c0, %c0_1] : memref<16x128xbf16, #tpu.memory_space<vmem>>, vector<16x128xbf16>
    %c0_2 = arith.constant 0 : index
    %c0_3 = arith.constant 0 : index
    %4 = vector.load %arg3[%c0_2, %c0_3] : memref<128x512xbf16, #tpu.memory_space<vmem>>, vector<128x512xbf16>
    %cst = arith.constant dense<0.000000e+00> : vector<16x512xf32>
    %5 = tpu.matmul %3, %4, %cst {dimension_numbers = #tpu.dot_dimension_numbers<[1], [0], [0], [1], [0, 0, 1, 1], [], []>} : vector<16x128xbf16>, vector<128x512xbf16>, vector<16x512xf32> -> vector<16x512xf32>
    %6 = vector.extract_strided_slice %5 {offsets = [0, 0], sizes = [16, 256], strides = [1, 1]} : vector<16x512xf32> to vector<16x256xf32>
    %7 = vector.extract_strided_slice %5 {offsets = [0, 256], sizes = [16, 256], strides = [1, 1]} : vector<16x512xf32> to vector<16x256xf32>
    %8 = arith.mulf %6, %7 : vector<16x256xf32>
    %9 = arith.negf %8 : vector<16x256xf32>
    %10 = math.exp %9 : vector<16x256xf32>
    %cst_4 = arith.constant 1.000000e+00 : f32
    %11 = vector.broadcast %cst_4 : f32 to vector<16x256xf32>
    %12 = arith.addf %11, %10 : vector<16x256xf32>
    %13 = arith.divf %11, %12 : vector<16x256xf32>
    %14 = arith.mulf %8, %13 : vector<16x256xf32>
    %c0_5 = arith.constant 0 : index
    %c0_6 = arith.constant 0 : index
    %15 = vector.load %arg6[%c0_5, %c0_6] : memref<16x128xf32, #tpu.memory_space<vmem>>, vector<16x128xf32>
    %16 = arith.truncf %14 : vector<16x256xf32> to vector<16x256xbf16>
    %c0_7 = arith.constant 0 : index
    %c0_8 = arith.constant 0 : index
    %17 = vector.load %arg4[%c0_7, %c0_8] : memref<256x128xbf16, #tpu.memory_space<vmem>>, vector<256x128xbf16>
    %cst_9 = arith.constant dense<0.000000e+00> : vector<16x128xf32>
    %18 = tpu.matmul %16, %17, %cst_9 {dimension_numbers = #tpu.dot_dimension_numbers<[1], [0], [0], [1], [0, 0, 1, 1], [], []>} : vector<16x256xbf16>, vector<256x128xbf16>, vector<16x128xf32> -> vector<16x128xf32>
    %19 = arith.addf %15, %18 : vector<16x128xf32>
    %c0_10 = arith.constant 0 : index
    %c0_11 = arith.constant 0 : index
    %20 = vector.load %arg6[%c0_10, %c0_11] : memref<16x128xf32, #tpu.memory_space<vmem>>, vector<16x128xf32>
    tpu.vector_store %arg6[%c0_10, %c0_11], %19 {strides = array<i32>} : memref<16x128xf32, #tpu.memory_space<vmem>>, vector<16x128xf32>,
    %c0_i32_12 = arith.constant 0 : i32
    %21 = arith.cmpi eq, %arg1, %c0_i32_12 : i32
    %22 = arith.extui %21 : i1 to i32
    %c0_i32_13 = arith.constant 0 : i32
    %23 = arith.cmpi ne, %22, %c0_i32_13 : i32
    scf.if %23 {
      %c0_14 = arith.constant 0 : index
      %c0_15 = arith.constant 0 : index
      %24 = vector.load %arg6[%c0_14, %c0_15] : memref<16x128xf32, #tpu.memory_space<vmem>>, vector<16x128xf32>
      %c0_16 = arith.constant 0 : index
      %c0_17 = arith.constant 0 : index
      %25 = vector.load %arg5[%c0_16, %c0_17] : memref<16x128xf32, #tpu.memory_space<vmem>>, vector<16x128xf32>
      tpu.vector_store %arg5[%c0_16, %c0_17], %24 {strides = array<i32>} : memref<16x128xf32, #tpu.memory_space<vmem>>, vector<16x128xf32>,
    } else {
    }
    return
  }
  func.func @transform_0(%arg0: i32, %arg1: i32) -> (i32, i32) {
    %c0_i32 = arith.constant 0 : i32
    %c0_i32_0 = arith.constant 0 : i32
    return %arg0, %c0_i32 : i32, i32
  }
  func.func @transform_1(%arg0: i32, %arg1: i32) -> (i32, i32) {
    %c0_i32 = arith.constant 0 : i32
    %c0_i32_0 = arith.constant 0 : i32
    return %c0_i32, %arg1 : i32, i32
  }
  func.func @transform_2(%arg0: i32, %arg1: i32) -> (i32, i32) {
    %c0_i32 = arith.constant 0 : i32
    %c0_i32_0 = arith.constant 0 : i32
    return %arg1, %c0_i32 : i32, i32
  }
  func.func @transform_3(%arg0: i32, %arg1: i32) -> (i32, i32) {
    %c0_i32 = arith.constant 0 : i32
    %c0_i32_0 = arith.constant 0 : i32
    return %arg0, %c0_i32 : i32, i32
  }
}

</mosaic_0001>

<bundles_post_ra>
// kernel: _ffn_impl.1
= control target key start
LH: loop header
LB: loop body
LE: loop exit
PB: predicated region body
PF: predicated region fallthrough
CT: control target
= control target key end

     0   :  { %v724_v2 = vmov 0   ;;  %s907_s0 = inlined_call_operand.vmem [shape: bf16[16,128], index: 0, kind: input, shape index: {}]   ;;  %s908_s1 = inlined_call_operand.vmem [shape: bf16[128,512], index: 1, kind: input, shape index: {}]   ;;  %s909_s2 = inlined_call_operand.vmem [shape: bf16[256,128], index: 2, kind: input, shape index: {}]   ;;  %s910_s3 = inlined_call_operand.hbm [shape: f32[16,128], index: 3, kind: output, shape index: {}]  }
   0x1   :  { %v619_v0 = vld [vmem:[%s908_s1 + $0x4] ss:$16 sps:$4 sm:$0xff]   ;;  %v621_v1 = vld [vmem:[%s908_s1 + $0xc] ss:$16 sps:$4 sm:$0xff]   ;;  %254 = vmatprep.mubr.bf16.mxu0 %v724_v2  ;;  %297 = vmatprep.mubr.bf16.mxu1 %v724_v2  ;;  %v623_v3 = vld [vmem:[%s908_s1] ss:$16 sps:$4 sm:$0xff]  }
   0x2   :  { %222 = vmatprep.subr.bf16.mxu0 %v619_v0  ;;  %v624_v4 = vld [vmem:[%s908_s1 + $0x8] ss:$16 sps:$4 sm:$0xff]   ;;  %265 = vmatprep.subr.bf16.mxu1 %v621_v1  ;;  %v625_v5 = vld [vmem:[%s908_s1 + $0x24] ss:$16 sps:$4 sm:$0xff]   ;;  %v627_v6 = vld [vmem:[%s908_s1 + $0x2c] ss:$16 sps:$4 sm:$0xff]  }
   0x3   :  { %223 = vmatpush1.bf16.msra.mxu0 %v623_v3  ;;  %266 = vmatpush1.bf16.msra.mxu1 %v624_v4  ;;  %v629_v7 = vld [vmem:[%s908_s1 + $0x20] ss:$16 sps:$4 sm:$0xff]   ;;  %v630_v8 = vld [vmem:[%s908_s1 + $0x28] ss:$16 sps:$4 sm:$0xff]   ;;  %v631_v9 = vld [vmem:[%s908_s1 + $0x44] ss:$16 sps:$4 sm:$0xff]  }
   0x4   :  { %224 = vmatprep.subr.bf16.mxu0 %v625_v5  ;;  %267 = vmatprep.subr.bf16.mxu1 %v627_v6  ;;  %v633_v10 = vld [vmem:[%s908_s1 + $0x4c] ss:$16 sps:$4 sm:$0xff]   ;;  %v635_v11 = vld [vmem:[%s908_s1 + $0x40] ss:$16 sps:$4 sm:$0xff]   ;;  %v636_v12 = vld [vmem:[%s908_s1 + $0x48] ss:$16 sps:$4 sm:$0xff]  }
   0x5   :  { %v637_v13 = vld [vmem:[%s908_s1 + $0x64] ss:$16 sps:$4 sm:$0xff]   ;;  %v639_v14 = vld [vmem:[%s908_s1 + $0x6c] ss:$16 sps:$4 sm:$0xff]   ;;  %v641_v15 = vld [vmem:[%s908_s1 + $0x60] ss:$16 sps:$4 sm:$0xff]  }
   0x6   :  { %v642_v16 = vld [vmem:[%s908_s1 + $0x68] ss:$16 sps:$4 sm:$0xff]   ;;  %v643_v17 = vld [vmem:[%s908_s1 + $0x84] ss:$16 sps:$4 sm:$0xff]   ;;  %v645_v18 = vld [vmem:[%s908_s1 + $0x8c] ss:$16 sps:$4 sm:$0xff]  }
   0x7   :  { %225 = vmatpush1.bf16.msra.mxu0 %v629_v7  ;;  %268 = vmatpush1.bf16.msra.mxu1 %v630_v8  ;;  %v647_v19 = vld [vmem:[%s908_s1 + $0x80] ss:$16 sps:$4 sm:$0xff]   ;;  %v648_v20 = vld [vmem:[%s908_s1 + $0x88] ss:$16 sps:$4 sm:$0xff]   ;;  %v649_v21 = vld [vmem:[%s908_s1 + $0xa4] ss:$16 sps:$4 sm:$0xff]  }
   0x8   :  { %226 = vmatprep.subr.bf16.mxu0 %v631_v9  ;;  %269 = vmatprep.subr.bf16.mxu1 %v633_v10  ;;  %v651_v22 = vld [vmem:[%s908_s1 + $0xac] ss:$16 sps:$4 sm:$0xff]   ;;  %v653_v23 = vld [vmem:[%s908_s1 + $0xa0] ss:$16 sps:$4 sm:$0xff]   ;;  %v654_v24 = vld [vmem:[%s908_s1 + $0xa8] ss:$16 sps:$4 sm:$0xff]  }
   0x9   :  { %v655_v25 = vld [vmem:[%s908_s1 + $0xc4] ss:$16 sps:$4 sm:$0xff]   ;;  %v657_v26 = vld [vmem:[%s908_s1 + $0xcc] ss:$16 sps:$4 sm:$0xff]   ;;  %v659_v27 = vld [vmem:[%s908_s1 + $0xc0] ss:$16 sps:$4 sm:$0xff]  }
   0xa   :  { %v660_v28 = vld [vmem:[%s908_s1 + $0xc8] ss:$16 sps:$4 sm:$0xff]   ;;  %v661_v29 = vld [vmem:[%s908_s1 + $0xe4] ss:$16 sps:$4 sm:$0xff]   ;;  %v663_v30 = vld [vmem:[%s908_s1 + $0xec] ss:$16 sps:$4 sm:$0xff]  }
   0xb   :  { %227 = vmatpush1.bf16.msra.mxu0 %v635_v11  ;;  %270 = vmatpush1.bf16.msra.mxu1 %v636_v12  ;;  %v665_v31 = vld [vmem:[%s908_s1 + $0xe0] ss:$16 sps:$4 sm:$0xff]   ;;  %v666_v32 = vld [vmem:[%s908_s1 + $0xe8] ss:$16 sps:$4 sm:$0xff]  }
   0xc   :  { %228 = vmatprep.subr.bf16.mxu0 %v637_v13  ;;  %271 = vmatprep.subr.bf16.mxu1 %v639_v14  ;;  %v667_v33 = vld [vmem:[%s907_s0] sm:$0xff]  }
   0xf   :  { %229 = vmatpush1.bf16.msra.mxu0 %v641_v15  ;;  %272 = vmatpush1.bf16.msra.mxu1 %v642_v16 }
  0x10   :  { %230 = vmatprep.subr.bf16.mxu0 %v643_v17  ;;  %273 = vmatprep.subr.bf16.mxu1 %v645_v18 }
  0x13   :  { %231 = vmatpush1.bf16.msra.mxu0 %v647_v19  ;;  %274 = vmatpush1.bf16.msra.mxu1 %v648_v20 }
  0x14   :  { %232 = vmatprep.subr.bf16.mxu0 %v649_v21  ;;  %275 = vmatprep.subr.bf16.mxu1 %v651_v22 }
  0x17   :  { %233 = vmatpush1.bf16.msra.mxu0 %v653_v23  ;;  %276 = vmatpush1.bf16.msra.mxu1 %v654_v24 }
  0x18   :  { %234 = vmatprep.subr.bf16.mxu0 %v655_v25  ;;  %277 = vmatprep.subr.bf16.mxu1 %v657_v26 }
  0x1b   :  { %235 = vmatpush1.bf16.msra.mxu0 %v659_v27  ;;  %278 = vmatpush1.bf16.msra.mxu1 %v660_v28 }
  0x1c   :  { %236 = vmatprep.subr.bf16.mxu0 %v661_v29  ;;  %279 = vmatprep.subr.bf16.mxu1 %v663_v30 }
  0x1f   :  { %237 = vmatpush1.bf16.msra.mxu0 %v665_v31  ;;  %280 = vmatpush1.bf16.msra.mxu1 %v666_v32 }
  0x20   :  { %8 = vsyncpa [#allocation4], 0  ;;  %v668_v34 = vld [vmem:[%s909_s2 + $0x40] sm:$0xff]   ;;  %v670_v36 = vld [vmem:[%s909_s2 + $0x48] sm:$0xff]  }
  0x21   :  { %v669_v35 = vld [vmem:[%s909_s2] sm:$0xff]   ;;  %593 = vmatprep.subr.bf16.mxu0 %v668_v34  ;;  %v671_v37 = vld [vmem:[%s909_s2 + $0x8] sm:$0xff]   ;;  %v672_v38 = vld [vmem:[%s909_s2 + $0x50] sm:$0xff]  }
  0x22   :  { %255 = vmatmul.mubr.bf16.vlgmr.msra.gmra.mrb[0].mxu0 %v667_v33  ;;  %298 = vmatmul.mubr.bf16.vlgmr.msra.gmra.mrb[0].mxu1 %v667_v33  ;;  %v673_v39 = vld [vmem:[%s909_s2 + $0x10] sm:$0xff]   ;;  %v674_v40 = vld [vmem:[%s909_s2 + $0x58] sm:$0xff]   ;;  %v676_v42 = vld [vmem:[%s909_s2 + $0x60] sm:$0xff]  }
  0x23   :  { %594 = vmatpush3.bf16.msra.mxu0 %v669_v35  ;;  %v675_v41 = vld [vmem:[%s909_s2 + $0x18] sm:$0xff]   ;;  %v677_v43 = vld [vmem:[%s909_s2 + $0x20] sm:$0xff]   ;;  %v678_v44 = vld [vmem:[%s909_s2 + $0x68] sm:$0xff]  }
  0x24   :  { %595 = vmatprep.subr.bf16.mxu0 %v670_v36  ;;  %v679_v45 = vld [vmem:[%s909_s2 + $0x28] sm:$0xff]   ;;  %v680_v46 = vld [vmem:[%s909_s2 + $0x70] sm:$0xff]   ;;  %v682_v48 = vld [vmem:[%s909_s2 + $0x78] sm:$0xff]  }
  0x25   :  { %v681_v47 = vld [vmem:[%s909_s2 + $0x30] sm:$0xff]   ;;  %v683_v49 = vld [vmem:[%s909_s2 + $0x38] sm:$0xff]   ;;  %s725_s2 = smov [#allocation3]  }
  0x26   :  { %s529_s27 = sshll.u32 %s725_s2, 4  ;;  %s530_s27 = int_to_ptr.vmem [resolvable:$true] %s529_s27 }
  0x27   :  { %596 = vmatpush3.bf16.msra.mxu0 %v671_v37  ;;  %s700_s1 = scalar_lea.vmem %s530_s27, 256  ;;  %p705_p1 = scmp.lt.s32.totalorder %s530_s27, %s530_s27 }
  0x28   :  { %597 = vmatprep.subr.bf16.mxu0 %v672_v38  ;;  %p701_p0 = scmp.ne.s32.totalorder %s530_s27, %s700_s1  ;;  %p706_p2 = scmp.lt.s32.totalorder %s700_s1, %s700_s1 }
  0x2a   :  { %p707_p3 = por %p706_p2, %p705_p1 }
  0x2b   :  { %598 = vmatpush3.bf16.msra.mxu0 %v673_v39 }
  0x2c   :  { %599 = vmatprep.subr.bf16.mxu0 %v674_v40  ;;  %p708_p4 = pnand %p707_p3, %p701_p0 }
  0x2f   :  { %600 = vmatpush3.bf16.msra.mxu0 %v675_v41 }
  0x30   :  { %601 = vmatprep.subr.bf16.mxu0 %v676_v42 }
  0x33   :  { %602 = vmatpush3.bf16.msra.mxu0 %v677_v43 }
  0x34   :  { %603 = vmatprep.subr.bf16.mxu0 %v678_v44 }
  0x37   :  { %604 = vmatpush3.bf16.msra.mxu0 %v679_v45 }
  0x38   :  { %605 = vmatprep.subr.bf16.mxu0 %v680_v46 }
  0x3b   :  { %606 = vmatpush3.bf16.msra.mxu0 %v681_v47 }
  0x3c   :  { %607 = vmatprep.subr.bf16.mxu0 %v682_v48 }
  0x3f   :  { %608 = vmatpush3.bf16.msra.mxu0 %v683_v49 }
  0xf5   :  { %v256_v50 = vpop.f32.mrb[0].mxu0  ;;  %v299_v51 = vpop.f32.mrb[0].mxu1 }
  0xf6   :  { %v308_v52 = vmul.f32 %v299_v51, %v256_v50  ;;  %v258_v53 = vpop.f32.mrb[1].mxu0  ;;  %v301_v54 = vpop.f32.mrb[1].mxu1 }
  0xf7   :  { %v309_v55 = vmul.f32 %v301_v54, %v258_v53  ;;  %v260_v56 = vpop.f32.mrb[2].mxu0  ;;  %v303_v57 = vpop.f32.mrb[2].mxu1 }
  0xf8   :  { %v573_v58 = vmul.f32 -1.442695, %v308_v52  ;;  %v310_v59 = vmul.f32 %v303_v57, %v260_v56  ;;  %v262_v60 = vpop.f32.mrb[3].mxu0  ;;  %v305_v61 = vpop.f32.mrb[3].mxu1 }
  0xf9   :  { %v574_v62 = vmul.f32 -1.442695, %v309_v55  ;;  %v311_v63 = vmul.f32 %v305_v61, %v262_v60 }
  0xfa   :  { %684 = vpow2.f32 %v573_v58  ;;  %v575_v0 = vmul.f32 -1.442695, %v310_v59 }
  0xfb   :  { %686 = vpow2.f32 %v574_v62  ;;  %v576_v1 = vmul.f32 -1.442695, %v311_v63 }
  0xfc   :  { %688 = vpow2.f32 %v575_v0 }
  0xfd   :  { %690 = vpow2.f32 %v576_v1 }
 0x104   :  { %v685_v2 = vpop.eup %684 }
 0x105   :  { %v687_v3 = vpop.eup %686  ;;  %v324_v4 = vadd.f32 1.0, %v685_v2 }
 0x106   :  { %v689_v5 = vpop.eup %688  ;;  %v325_v6 = vadd.f32 1.0, %v687_v3 }
 0x107   :  { %v691_v7 = vpop.eup %690  ;;  %692 = vrcp.f32 %v324_v4  ;;  %v326_v8 = vadd.f32 1.0, %v689_v5 }
 0x108   :  { %694 = vrcp.f32 %v325_v6  ;;  %v327_v9 = vadd.f32 1.0, %v691_v7 }
 0x109   :  { %696 = vrcp.f32 %v326_v8 }
 0x10a   :  { %698 = vrcp.f32 %v327_v9 }
 0x111   :  { %v693_v10 = vpop.eup %692 }
 0x112   :  { %v695_v11 = vpop.eup %694  ;;  %v336_v14 = vmul.f32 %v693_v10, %v308_v52 }
 0x113   :  { %v697_v12 = vpop.eup %696  ;;  %v337_v16 = vmul.f32 %v695_v11, %v309_v55 }
 0x114   :  { %v699_v13 = vpop.eup %698  ;;  %v338_v15 = vmul.f32 %v697_v12, %v310_v59 }
 0x115   :  { %v339_v17 = vmul.f32 %v699_v13, %v311_v63 }
 0x116   :  { %v342_v18 = vpack.c.bf16 %v338_v15, %v336_v14 }
 0x117   :  { %v343_v19 = vpack.c.bf16 %v339_v17, %v337_v16 }
 0x119   :  { %504 = vmatprep.mubr.bf16.mxu0 %v343_v19 }
 0x11a   :  { %505 = vmatmul.mubr.bf16.vlgmr.msra.gmra.mrb[4].mxu0 %v342_v18 }
 0x1ed   :  { %v609_v20 = vpop.f32.mrb[4].mxu0 }
 0x1ee   :  { %v610_v21 = vpop.f32.mrb[5].mxu0 }
 0x1ef   :  { %v611_v22 = vadd.f32 %v610_v21, %v609_v20  ;;  %v612_v23 = vpop.f32.mrb[6].mxu0 }
 0x1f0   :  { %v613_v24 = vpop.f32.mrb[7].mxu0 }
 0x1f1   :  { %522 = vst [vmem:[#allocation3] sm:$0xff] %v611_v22  ;;  %v614_v25 = vadd.f32 %v613_v24, %v612_v23 }
 0x1f3   :  { %523 = vst [vmem:[#allocation3 + $0x8] sm:$0xff] %v614_v25 }
 0x1f4   :  { %711 = shalt.err (!%p708_p4)
}
 0x1f5   :  { %s712_s29 = scalar_lea.hbm %s910_s3, 256 }
 0x1f6   :  { %p713_p5 = scmp.ne.s32.totalorder %s910_s3, %s712_s29  ;;  %p716_p6 = scmp.lt.u32.totalorder %s712_s29, %s910_s3 }
 0x1f8   :  { %p718_p7 = pnand %p716_p6, %p713_p5 }
 0x1fa   :  { %721 = shalt.err (!%p718_p7)
}
 0x1fb   :  { %s726_s7 = smov 128   ;;  %s727_s8 = smov 8  }
 0x1fc   :  { %535 = dma.vmem_to_hbm [thread:$0]  %s530_s27, 256, %s910_s3, [#allocation4], %s726_s7, %s726_s7, %s727_s8  }
 0x1fd   :  { %722 = dma.done.wait [#allocation4], 256  }
 0x1fe   :  { %723 = vsyncadd [#allocation4], 4294967040 }
 0x1ff   :  { %539 = vsyncpa [#allocation4], 1 }

</bundles_post_ra>
